<compile_context>
chip_gen: v5e
topology: v5e:2x2
jax: 0.10.0
libtpu: 0.0.40
codegen_flags: <defaults>
</compile_context>

<pallas_src>
import functools

import jax
import jax.numpy as jnp
from jax import lax
from jax.experimental import pallas as pl
from jax.experimental.pallas import tpu as pltpu


def _round_up(x, m):
    return ((x + m - 1) // m) * m


# ----------------------------------------------------------------------------
# pltpu.roll direction probe (tiny one-off kernel, cached).
#   "fwd"  : roll(x, 1, 0)[i] == x[i-1]   (jnp.roll convention)
#   "rev"  : roll(x, 1, 0)[i] == x[i+1]
#   "none" : roll unavailable -> concat-based shifts
# ----------------------------------------------------------------------------
_ROLL_MODE = None


def _roll_probe_kernel(x_ref, o_ref):
    o_ref[...] = pltpu.roll(x_ref[...], 1, 0)


def _detect_roll_mode():
    global _ROLL_MODE
    if _ROLL_MODE is not None:
        return _ROLL_MODE
    try:
        x = jnp.tile(jnp.arange(8, dtype=jnp.float32)[:, None], (1, 128))
        y = jax.device_get(pl.pallas_call(
            _roll_probe_kernel,
            out_shape=jax.ShapeDtypeStruct((8, 128), jnp.float32))(x))
        if float(y[1, 0]) == 0.0:
            _ROLL_MODE = "fwd"
        elif float(y[0, 0]) == 1.0:
            _ROLL_MODE = "rev"
        else:
            _ROLL_MODE = "none"
    except Exception:
        _ROLL_MODE = "none"
    return _ROLL_MODE


def _vmem_limit_bytes():
    # Generation-aware VMEM request: ~75% of physical (~48 MiB v7x, ~96 MiB v5e/v6e).
    try:
        cap = int(pltpu.get_tpu_info().vmem_capacity_bytes)
        return max(32 * 1024 * 1024, (cap * 3) // 4)
    except Exception:
        return 48 * 1024 * 1024


def _choose_ts(S, C, Hp, K, hb, isz, wsz, vmem_limit, batch):
    """Largest sequence tile (multiple of hb, <= 512) whose footprint fits VMEM."""
    budget = (vmem_limit * 11) // 20                     # ~55% of requested limit
    budget -= 2 * (K * C * Hp * wsz + Hp * 4)            # weight/bias (worst-case dbuf)
    cap = min(512, _round_up(S, hb))
    if batch == 1 and S > hb:
        # Keep >= 2 sequence tiles so both v7x TensorCores get work.
        cap = min(cap, max(hb, _round_up((S + 1) // 2, hb)))

    def footprint(t):
        return (2 * t * C * isz          # current tile, double buffered
                + 4 * hb * C * isz       # two halo streams, double buffered
                + 2 * t * Hp * isz       # output tile, double buffered
                + 3 * t * C * 4          # shifted-tap temporaries
                + 2 * t * Hp * 4)        # f32 accumulator / tanh temp

    best = hb
    t = hb
    while t <= cap:
        if footprint(t) <= budget:
            best = t
        t += hb
    return best


def _conv1d_tanh_kernel(xp_ref, xc_ref, xn_ref, w_ref, b_ref, o_ref, *,
                        ts, pad, ktaps, c_in, compute_dtype, roll_mode,
                        use_general):
    # xp_ref : (1, HB, C)  halo block just before this sequence tile
    # xc_ref : (1, TS, C)  current sequence tile
    # xn_ref : (1, HB, C)  halo block just after this sequence tile
    # w_ref  : (K*C, Hp)   Conv1d weight, tap-major rows (tap t -> rows t*C:(t+1)*C)
    # b_ref  : (1, Hp)     bias (f32)
    # o_ref  : (1, TS, Hp)
    xc = xc_ref[0]                                        # (TS, C)

    def cast(v):
        return v.astype(compute_dtype) if compute_dtype is not None else v

    if pad == 0:
        acc = jnp.dot(cast(xc), w_ref[...], preferred_element_type=jnp.float32)
    elif (not use_general) and pad == 1 and c_in % 8 == 0:
        si = pl.program_id(1)
        ns = pl.num_programs(1)
        hb = xp_ref.shape[1]
        zero_row = jnp.zeros((1, c_in), dtype=xc.dtype)
        # Row just before / after this tile; zeroed at the sequence boundaries.
        prev_row = jnp.where(si > 0, xp_ref[0, hb - 1:hb, :], zero_row)
        next_row = jnp.where(si < ns - 1, xn_ref[0, 0:1, :], zero_row)

        if roll_mode in ("fwd", "rev"):
            sh_back = 1 if roll_mode == "fwd" else ts - 1   # rolled[i] = xc[i-1]
            sh_fwd = ts - 1 if roll_mode == "fwd" else 1    # rolled[i] = xc[i+1]
            row = lax.broadcasted_iota(jnp.int32, (ts, 1), 0)
            lhs_m1 = jnp.where(row >= 1, pltpu.roll(xc, sh_back, 0), prev_row)
            lhs_p1 = jnp.where(row <= ts - 2, pltpu.roll(xc, sh_fwd, 0), next_row)
        else:
            lhs_m1 = jnp.concatenate([prev_row, xc[:ts - 1, :]], axis=0)
            lhs_p1 = jnp.concatenate([xc[1:, :], next_row], axis=0)

        # Center tap straight from the tile (no shift, no copy), then +/-1 taps.
        acc = jnp.dot(cast(xc), w_ref[c_in:2 * c_in, :],
                      preferred_element_type=jnp.float32)
        acc = acc + jnp.dot(cast(lhs_m1), w_ref[0:c_in, :],
                            preferred_element_type=jnp.float32)
        acc = acc + jnp.dot(cast(lhs_p1), w_ref[2 * c_in:3 * c_in, :],
                            preferred_element_type=jnp.float32)
    else:
        # General odd-K fallback: fold the K taps into the contraction dim.
        si = pl.program_id(1)
        ns = pl.num_programs(1)
        hb = xp_ref.shape[1]
        prev = xp_ref[0][hb - pad:, :]                    # (pad, C) rows before tile
        nxt = xn_ref[0][:pad, :]                          # (pad, C) rows after tile
        prev = jnp.where(si > 0, prev, jnp.zeros_like(prev))
        nxt = jnp.where(si < ns - 1, nxt, jnp.zeros_like(nxt))
        ext = jnp.concatenate([prev, xc, nxt], axis=0)    # (TS + 2*pad, C)
        lhs = jnp.concatenate([ext[t:t + ts, :] for t in range(ktaps)], axis=1)
        acc = jnp.dot(cast(lhs), w_ref[...], preferred_element_type=jnp.float32)

    acc = acc + b_ref[...]                                # (1, Hp) f32 broadcast
    o_ref[0] = jnp.tanh(acc).astype(o_ref.dtype)


def seq2seqvec_cnn_forward(x, weight, bias, *, ts=None, compute_dtype=jnp.bfloat16):
    """Forward of Seq2SeqVec_CNN: tanh(Conv1d_same(x) + bias).

    x: (B, S, C); weight: (H, C, K) [PyTorch Conv1d layout]; bias: (H,).
    compute_dtype: MXU operand dtype (bf16 default); accumulation, bias add and
    tanh stay in f32.  Pass None for an all-f32 matmul.
    """
    B, S, C = x.shape
    H, C_w, K = weight.shape
    assert C == C_w and K % 2 == 1
    pad = (K - 1) // 2

    out_dtype = x.dtype
    isz = jnp.dtype(out_dtype).itemsize
    wsz = jnp.dtype(compute_dtype).itemsize if compute_dtype is not None else 4

    # Lane-dense output: pad H up to 128 so the output stores are unmasked vst.
    Hp = 128 if H < 128 else H
    # Halo block height: multiple of 8 sublanes covering the conv halo.
    hb = max(8, _round_up(pad, 8))

    vmem_limit = _vmem_limit_bytes()
    if ts is None:
        ts = _choose_ts(S, C, Hp, K, hb, isz, wsz, vmem_limit, B)
    ts = max(hb, _round_up(int(ts), hb))

    ns = -(-S // ts)                 # number of sequence tiles
    S_pad = ns * ts                  # ragged seq -> zero-pad the tail (sliced off later)
    x_in = x if S_pad == S else jnp.pad(x, ((0, 0), (0, S_pad - S), (0, 0)))
    n_hblocks = S_pad // hb
    tpb = ts // hb                   # halo blocks per sequence tile

    # Conv1d weight (H, C, K) -> (K*C, Hp), tap-major rows; bias -> (1, Hp) f32.
    w2 = jnp.transpose(weight, (2, 1, 0)).reshape(K * C, H)
    b2 = bias.reshape(1, H).astype(jnp.float32)
    if Hp != H:
        w2 = jnp.pad(w2, ((0, 0), (0, Hp - H)))
        b2 = jnp.pad(b2, ((0, 0), (0, Hp - H)))
    if compute_dtype is not None:
        w2 = w2.astype(compute_dtype)

    roll_mode = _detect_roll_mode() if (pad == 1 and C % 8 == 0) else "none"

    def x_prev_map(b, s):
        return (b, jnp.maximum(s * tpb - 1, 0), 0)

    def x_curr_map(b, s):
        return (b, s, 0)

    def x_next_map(b, s):
        return (b, jnp.minimum((s + 1) * tpb, n_hblocks - 1), 0)

    cost = pl.CostEstimate(
        flops=2 * B * S_pad * C * Hp * K,
        transcendentals=B * S_pad * Hp,
        bytes_accessed=int(B * S_pad * C * isz            # x (current-tile stream)
                           + 2 * B * ns * hb * C * isz    # halo re-reads
                           + K * C * Hp * wsz + Hp * 4    # weight + bias
                           + B * S_pad * Hp * isz),       # output
    )

    def build(single_buffer_consts, mode, use_general):
        kern = functools.partial(
            _conv1d_tanh_kernel, ts=ts, pad=pad, ktaps=K, c_in=C,
            compute_dtype=compute_dtype, roll_mode=mode, use_general=use_general)
        const_kw = {"pipeline_mode": pl.Buffered(1)} if single_buffer_consts else {}
        return pl.pallas_call(
            kern,
            out_shape=jax.ShapeDtypeStruct((B, S_pad, Hp), out_dtype),
            grid_spec=pltpu.PrefetchScalarGridSpec(
                num_scalar_prefetch=0,
                grid=(B, ns),
                in_specs=[
                    pl.BlockSpec((1, hb, C), x_prev_map),     # halo before the tile
                    pl.BlockSpec((1, ts, C), x_curr_map),     # the tile itself
                    pl.BlockSpec((1, hb, C), x_next_map),     # halo after the tile
                    pl.BlockSpec((K * C, Hp), lambda b, s: (0, 0), **const_kw),
                    pl.BlockSpec((1, Hp), lambda b, s: (0, 0), **const_kw),
                ],
                out_specs=pl.BlockSpec((1, ts, Hp), lambda b, s: (b, s, 0)),
            ),
            compiler_params=pltpu.CompilerParams(
                dimension_semantics=("parallel", "parallel"),
                vmem_limit_bytes=vmem_limit,
            ),
            cost_estimate=cost,
        )

    try:
        # Optimized config: single-buffered constants + XLU-roll tap shifts.
        out = jax.block_until_ready(
            build(True, roll_mode, False)(x_in, x_in, x_in, w2, b2))
    except Exception:
        # Safe fallback: default buffering + folded-concat contraction.
        out = jax.block_until_ready(
            build(False, "none", True)(x_in, x_in, x_in, w2, b2))

    if S_pad != S or Hp != H:
        out = out[:, :S, :H]
    return out


def _reference(x, weight, bias):
    # Pure-JAX reference of the PyTorch forward (Conv1d is cross-correlation).
    B, S, C = x.shape
    H, _, K = weight.shape
    pad = (K - 1) // 2
    xp = jnp.pad(x.astype(jnp.float32), ((0, 0), (pad, pad), (0, 0)))
    out = jnp.zeros((B, S, H), dtype=jnp.float32)
    for k in range(K):
        out = out + jnp.einsum('bsc,hc->bsh', xp[:, k:k + S, :],
                               weight[:, :, k].astype(jnp.float32),
                               precision=jax.lax.Precision.HIGHEST)
    return jnp.tanh(out + bias[None, None, :]).astype(x.dtype)


if __name__ == "__main__":
    key = jax.random.PRNGKey(0)
    keys = jax.random.split(key, 9)

    # ---- Test 1: small shapes consistent with the module (bf16 MXU default) --
    batch, seq_len, input_size, hidden_size, kernel_size = 2, 8, 4, 32, 3
    x = jax.random.normal(keys[0], (batch, seq_len, input_size), dtype=jnp.float32)
    bound = 1.0 / float(input_size * kernel_size) ** 0.5
    weight = jax.random.uniform(keys[1], (hidden_size, input_size, kernel_size),
                                minval=-bound, maxval=bound, dtype=jnp.float32)
    bias = jax.random.uniform(keys[2], (hidden_size,),
                              minval=-bound, maxval=bound, dtype=jnp.float32)
    out = seq2seqvec_cnn_forward(x, weight, bias)
    ref = _reference(x, weight, bias)
    assert out.shape == (batch, seq_len, hidden_size)
    assert jnp.allclose(out, ref, atol=2e-2, rtol=0), \
        float(jnp.max(jnp.abs(out - ref)))

    # ---- Test 2: larger shapes, sequence tiling + halos ----------------------
    B2, S2, C2, H2, K2 = 2, 256, 128, 128, 3
    x2 = jax.random.normal(keys[3], (B2, S2, C2), dtype=jnp.float32)
    bound2 = 1.0 / float(C2 * K2) ** 0.5
    w2 = jax.random.uniform(keys[4], (H2, C2, K2), minval=-bound2, maxval=bound2,
                            dtype=jnp.float32)
    b2 = jax.random.uniform(keys[5], (H2,), minval=-bound2, maxval=bound2,
                            dtype=jnp.float32)
    ref2 = _reference(x2, w2, b2)

    # f32 MXU path, forced 2 tiles per batch element (checks halo handling).
    out2_f32 = seq2seqvec_cnn_forward(x2, w2, b2, ts=128, compute_dtype=None)
    assert out2_f32.shape == (B2, S2, H2)
    assert jnp.allclose(out2_f32, ref2, atol=2e-2, rtol=0), \
        float(jnp.max(jnp.abs(out2_f32 - ref2)))

    # bf16 MXU path with automatic tile selection.
    out2_bf16 = seq2seqvec_cnn_forward(x2, w2, b2)
    assert jnp.allclose(out2_bf16, ref2, atol=6e-2, rtol=0), \
        float(jnp.max(jnp.abs(out2_bf16 - ref2)))

    # ---- Test 3: ragged seq_len (S % 8 != 0) + small H (lane padding) --------
    B3, S3, C3, H3, K3 = 2, 100, 128, 64, 3
    x3 = jax.random.normal(keys[6], (B3, S3, C3), dtype=jnp.float32)
    bound3 = 1.0 / float(C3 * K3) ** 0.5
    w3 = jax.random.uniform(keys[7], (H3, C3, K3), minval=-bound3, maxval=bound3,
                            dtype=jnp.float32)
    b3 = jax.random.uniform(keys[8], (H3,), minval=-bound3, maxval=bound3,
                            dtype=jnp.float32)
    ref3 = _reference(x3, w3, b3)
    out3 = seq2seqvec_cnn_forward(x3, w3, b3, ts=48)   # 3 tiles, zero-padded tail
    assert out3.shape == (B3, S3, H3)
    assert jnp.allclose(out3, ref3, atol=6e-2, rtol=0), \
        float(jnp.max(jnp.abs(out3 - ref3)))

    print("KERNEL_OK")
</pallas_src>

<mosaic_0001>
module attributes {stable_mosaic.version = 11 : i64} {
  func.func @_conv1d_tanh_kernel(%arg0: i32, %arg1: i32, %arg2: memref<1x8x4xf32, #tpu.memory_space<vmem>>, %arg3: memref<1x8x4xf32, #tpu.memory_space<vmem>>, %arg4: memref<1x8x4xf32, #tpu.memory_space<vmem>>, %arg5: memref<12x128xbf16, #tpu.memory_space<vmem>>, %arg6: memref<1x128xf32, #tpu.memory_space<vmem>>, %arg7: memref<1x8x128xf32, #tpu.memory_space<vmem>>) attributes {dimension_semantics = [#tpu.dimension_semantics<parallel>, #tpu.dimension_semantics<parallel>], iteration_bounds = array<i64: 2, 1>, scalar_prefetch = 0 : i64, scratch_operands = 0 : i64, tpu.core_type = #tpu.core_type<tc>, window_params = [{transform_indices = @transform_0, window_bounds = array<i64: 1, 8, 4>}, {transform_indices = @transform_1, window_bounds = array<i64: 1, 8, 4>}, {transform_indices = @transform_2, window_bounds = array<i64: 1, 8, 4>}, {pipeline_mode = #tpu.pipeline_mode<synchronous>, transform_indices = @transform_3, window_bounds = array<i64: 12, 128>}, {pipeline_mode = #tpu.pipeline_mode<synchronous>, transform_indices = @transform_4, window_bounds = array<i64: 1, 128>}, {transform_indices = @transform_5, window_bounds = array<i64: 1, 8, 128>}]} {
    %c0 = arith.constant 0 : index
    %c0_0 = arith.constant 0 : index
    %c0_1 = arith.constant 0 : index
    %0 = vector.load %arg3[%c0, %c0_0, %c0_1] : memref<1x8x4xf32, #tpu.memory_space<vmem>>, vector<1x8x4xf32>
    %1 = vector.shape_cast %0 : vector<1x8x4xf32> to vector<8x4xf32>
    %c0_2 = arith.constant 0 : index
    %c0_3 = arith.constant 0 : index
    %c0_4 = arith.constant 0 : index
    %2 = vector.load %arg2[%c0_2, %c0_3, %c0_4] : memref<1x8x4xf32, #tpu.memory_space<vmem>>, vector<1x8x4xf32>
    %3 = vector.shape_cast %2 : vector<1x8x4xf32> to vector<8x4xf32>
    %4 = vector.extract_strided_slice %3 {offsets = [7, 0], sizes = [1, 4], strides = [1, 1]} : vector<8x4xf32> to vector<1x4xf32>
    %c0_5 = arith.constant 0 : index
    %c0_6 = arith.constant 0 : index
    %c0_7 = arith.constant 0 : index
    %5 = vector.load %arg4[%c0_5, %c0_6, %c0_7] : memref<1x8x4xf32, #tpu.memory_space<vmem>>, vector<1x8x4xf32>
    %6 = vector.shape_cast %5 : vector<1x8x4xf32> to vector<8x4xf32>
    %7 = vector.extract_strided_slice %6 {offsets = [0, 0], sizes = [1, 4], strides = [1, 1]} : vector<8x4xf32> to vector<1x4xf32>
    %c0_i32 = arith.constant 0 : i32
    %8 = arith.cmpi sgt, %arg1, %c0_i32 : i32
    %cst = arith.constant 0.000000e+00 : f32
    %9 = vector.broadcast %cst : f32 to vector<1x4xf32>
    %10 = arith.select %8, %4, %9 : vector<1x4xf32>
    %c0_i32_8 = arith.constant 0 : i32
    %11 = arith.cmpi slt, %arg1, %c0_i32_8 : i32
    %cst_9 = arith.constant 0.000000e+00 : f32
    %12 = vector.broadcast %cst_9 : f32 to vector<1x4xf32>
    %13 = arith.select %11, %7, %12 : vector<1x4xf32>
    %14 = tpu.concatenate %10, %1, %13 in 0 : vector<1x4xf32>, vector<8x4xf32>, vector<1x4xf32> -> vector<10x4xf32>
    %15 = vector.extract_strided_slice %14 {offsets = [0, 0], sizes = [8, 4], strides = [1, 1]} : vector<10x4xf32> to vector<8x4xf32>
    %16 = vector.extract_strided_slice %14 {offsets = [1, 0], sizes = [8, 4], strides = [1, 1]} : vector<10x4xf32> to vector<8x4xf32>
    %17 = vector.extract_strided_slice %14 {offsets = [2, 0], sizes = [8, 4], strides = [1, 1]} : vector<10x4xf32> to vector<8x4xf32>
    %18 = tpu.concatenate %15, %16, %17 in 1 : vector<8x4xf32>, vector<8x4xf32>, vector<8x4xf32> -> vector<8x12xf32>
    %19 = arith.truncf %18 : vector<8x12xf32> to vector<8x12xbf16>
    %c0_10 = arith.constant 0 : index
    %c0_11 = arith.constant 0 : index
    %20 = vector.load %arg5[%c0_10, %c0_11] : memref<12x128xbf16, #tpu.memory_space<vmem>>, vector<12x128xbf16>
    %cst_12 = arith.constant dense<0.000000e+00> : vector<8x128xf32>
    %21 = tpu.matmul %19, %20, %cst_12 {dimension_numbers = #tpu.dot_dimension_numbers<[1], [0], [0], [1], [0, 0, 1, 1], [], []>} : vector<8x12xbf16>, vector<12x128xbf16>, vector<8x128xf32> -> vector<8x128xf32>
    %c0_13 = arith.constant 0 : index
    %c0_14 = arith.constant 0 : index
    %22 = vector.load %arg6[%c0_13, %c0_14] : memref<1x128xf32, #tpu.memory_space<vmem>>, vector<1x128xf32>
    %23 = vector.broadcast %22 : vector<1x128xf32> to vector<8x128xf32>
    %24 = arith.addf %21, %23 : vector<8x128xf32>
    %25 = math.tanh %24 : vector<8x128xf32>
    %c0_15 = arith.constant 0 : index
    %c0_16 = arith.constant 0 : index
    %c0_17 = arith.constant 0 : index
    %26 = vector.load %arg7[%c0_15, %c0_16, %c0_17] : memref<1x8x128xf32, #tpu.memory_space<vmem>>, vector<1x8x128xf32>
    %27 = vector.shape_cast %26 : vector<1x8x128xf32> to vector<8x128xf32>
    %28 = vector.shape_cast %25 : vector<8x128xf32> to vector<1x8x128xf32>
    tpu.vector_store %arg7[%c0_15, %c0_16, %c0_17], %28 {strides = array<i32>} : memref<1x8x128xf32, #tpu.memory_space<vmem>>, vector<1x8x128xf32>,
    return
  }
  func.func @transform_0(%arg0: i32, %arg1: i32) -> (i32, i32, i32) {
    %c1_i32 = arith.constant 1 : i32
    %0 = arith.muli %arg1, %c1_i32 : i32
    %c1_i32_0 = arith.constant 1 : i32
    %1 = arith.subi %0, %c1_i32_0 : i32
    %c0_i32 = arith.constant 0 : i32
    %2 = arith.maxsi %1, %c0_i32 : i32
    %c0_i32_1 = arith.constant 0 : i32
    %c0_i32_2 = arith.constant 0 : i32
    return %arg0, %2, %c0_i32_1 : i32, i32, i32
  }
  func.func @transform_1(%arg0: i32, %arg1: i32) -> (i32, i32, i32) {
    %c0_i32 = arith.constant 0 : i32
    %c0_i32_0 = arith.constant 0 : i32
    return %arg0, %arg1, %c0_i32 : i32, i32, i32
  }
  func.func @transform_2(%arg0: i32, %arg1: i32) -> (i32, i32, i32) {
    %c1_i32 = arith.constant 1 : i32
    %0 = arith.addi %arg1, %c1_i32 : i32
    %c1_i32_0 = arith.constant 1 : i32
    %1 = arith.muli %0, %c1_i32_0 : i32
    %c0_i32 = arith.constant 0 : i32
    %2 = arith.minsi %1, %c0_i32 : i32
    %c0_i32_1 = arith.constant 0 : i32
    %c0_i32_2 = arith.constant 0 : i32
    return %arg0, %2, %c0_i32_1 : i32, i32, i32
  }
  func.func @transform_3(%arg0: i32, %arg1: i32) -> (i32, i32) {
    %c0_i32 = arith.constant 0 : i32
    %c0_i32_0 = arith.constant 0 : i32
    %c0_i32_1 = arith.constant 0 : i32
    return %c0_i32, %c0_i32_0 : i32, i32
  }
  func.func @transform_4(%arg0: i32, %arg1: i32) -> (i32, i32) {
    %c0_i32 = arith.constant 0 : i32
    %c0_i32_0 = arith.constant 0 : i32
    %c0_i32_1 = arith.constant 0 : i32
    return %c0_i32, %c0_i32_0 : i32, i32
  }
  func.func @transform_5(%arg0: i32, %arg1: i32) -> (i32, i32, i32) {
    %c0_i32 = arith.constant 0 : i32
    %c0_i32_0 = arith.constant 0 : i32
    return %arg0, %arg1, %c0_i32 : i32, i32, i32
  }
}

module attributes {stable_mosaic.version = 11 : i64} {
  func.func @_conv1d_tanh_kernel(%arg0: i32, %arg1: i32, %arg2: memref<1x8x4xf32, #tpu.memory_space<vmem>>, %arg3: memref<1x8x4xf32, #tpu.memory_space<vmem>>, %arg4: memref<1x8x4xf32, #tpu.memory_space<vmem>>, %arg5: memref<12x128xbf16, #tpu.memory_space<vmem>>, %arg6: memref<1x128xf32, #tpu.memory_space<vmem>>, %arg7: memref<1x8x128xf32, #tpu.memory_space<vmem>>) attributes {dimension_semantics = [#tpu.dimension_semantics<parallel>, #tpu.dimension_semantics<parallel>], iteration_bounds = array<i64: 2, 1>, scalar_prefetch = 0 : i64, scratch_operands = 0 : i64, tpu.core_type = #tpu.core_type<tc>, window_params = [{transform_indices = @transform_0, window_bounds = array<i64: 1, 8, 4>}, {transform_indices = @transform_1, window_bounds = array<i64: 1, 8, 4>}, {transform_indices = @transform_2, window_bounds = array<i64: 1, 8, 4>}, {pipeline_mode = #tpu.pipeline_mode<synchronous>, transform_indices = @transform_3, window_bounds = array<i64: 12, 128>}, {pipeline_mode = #tpu.pipeline_mode<synchronous>, transform_indices = @transform_4, window_bounds = array<i64: 1, 128>}, {transform_indices = @transform_5, window_bounds = array<i64: 1, 8, 128>}]} {
    %c0 = arith.constant 0 : index
    %c0_0 = arith.constant 0 : index
    %c0_1 = arith.constant 0 : index
    %0 = vector.load %arg3[%c0, %c0_0, %c0_1] : memref<1x8x4xf32, #tpu.memory_space<vmem>>, vector<1x8x4xf32>
    %1 = vector.shape_cast %0 : vector<1x8x4xf32> to vector<8x4xf32>
    %c0_2 = arith.constant 0 : index
    %c0_3 = arith.constant 0 : index
    %c0_4 = arith.constant 0 : index
    %2 = vector.load %arg2[%c0_2, %c0_3, %c0_4] : memref<1x8x4xf32, #tpu.memory_space<vmem>>, vector<1x8x4xf32>
    %3 = vector.shape_cast %2 : vector<1x8x4xf32> to vector<8x4xf32>
    %4 = vector.extract_strided_slice %3 {offsets = [7, 0], sizes = [1, 4], strides = [1, 1]} : vector<8x4xf32> to vector<1x4xf32>
    %c0_5 = arith.constant 0 : index
    %c0_6 = arith.constant 0 : index
    %c0_7 = arith.constant 0 : index
    %5 = vector.load %arg4[%c0_5, %c0_6, %c0_7] : memref<1x8x4xf32, #tpu.memory_space<vmem>>, vector<1x8x4xf32>
    %6 = vector.shape_cast %5 : vector<1x8x4xf32> to vector<8x4xf32>
    %7 = vector.extract_strided_slice %6 {offsets = [0, 0], sizes = [1, 4], strides = [1, 1]} : vector<8x4xf32> to vector<1x4xf32>
    %c0_i32 = arith.constant 0 : i32
    %8 = arith.cmpi sgt, %arg1, %c0_i32 : i32
    %cst = arith.constant 0.000000e+00 : f32
    %9 = vector.broadcast %cst : f32 to vector<1x4xf32>
    %10 = arith.select %8, %4, %9 : vector<1x4xf32>
    %c0_i32_8 = arith.constant 0 : i32
    %11 = arith.cmpi slt, %arg1, %c0_i32_8 : i32
    %cst_9 = arith.constant 0.000000e+00 : f32
    %12 = vector.broadcast %cst_9 : f32 to vector<1x4xf32>
    %13 = arith.select %11, %7, %12 : vector<1x4xf32>
    %14 = tpu.concatenate %10, %1, %13 in 0 : vector<1x4xf32>, vector<8x4xf32>, vector<1x4xf32> -> vector<10x4xf32>
    %15 = vector.extract_strided_slice %14 {offsets = [0, 0], sizes = [8, 4], strides = [1, 1]} : vector<10x4xf32> to vector<8x4xf32>
    %16 = vector.extract_strided_slice %14 {offsets = [1, 0], sizes = [8, 4], strides = [1, 1]} : vector<10x4xf32> to vector<8x4xf32>
    %17 = vector.extract_strided_slice %14 {offsets = [2, 0], sizes = [8, 4], strides = [1, 1]} : vector<10x4xf32> to vector<8x4xf32>
    %18 = tpu.concatenate %15, %16, %17 in 1 : vector<8x4xf32>, vector<8x4xf32>, vector<8x4xf32> -> vector<8x12xf32>
    %19 = arith.truncf %18 : vector<8x12xf32> to vector<8x12xbf16>
    %c0_10 = arith.constant 0 : index
    %c0_11 = arith.constant 0 : index
    %20 = vector.load %arg5[%c0_10, %c0_11] : memref<12x128xbf16, #tpu.memory_space<vmem>>, vector<12x128xbf16>
    %cst_12 = arith.constant dense<0.000000e+00> : vector<8x128xf32>
    %21 = tpu.matmul %19, %20, %cst_12 {dimension_numbers = #tpu.dot_dimension_numbers<[1], [0], [0], [1], [0, 0, 1, 1], [], []>} : vector<8x12xbf16>, vector<12x128xbf16>, vector<8x128xf32> -> vector<8x128xf32>
    %c0_13 = arith.constant 0 : index
    %c0_14 = arith.constant 0 : index
    %22 = vector.load %arg6[%c0_13, %c0_14] : memref<1x128xf32, #tpu.memory_space<vmem>>, vector<1x128xf32>
    %23 = vector.broadcast %22 : vector<1x128xf32> to vector<8x128xf32>
    %24 = arith.addf %21, %23 : vector<8x128xf32>
    %25 = math.tanh %24 : vector<8x128xf32>
    %c0_15 = arith.constant 0 : index
    %c0_16 = arith.constant 0 : index
    %c0_17 = arith.constant 0 : index
    %26 = vector.load %arg7[%c0_15, %c0_16, %c0_17] : memref<1x8x128xf32, #tpu.memory_space<vmem>>, vector<1x8x128xf32>
    %27 = vector.shape_cast %26 : vector<1x8x128xf32> to vector<8x128xf32>
    %28 = vector.shape_cast %25 : vector<8x128xf32> to vector<1x8x128xf32>
    tpu.vector_store %arg7[%c0_15, %c0_16, %c0_17], %28 {strides = array<i32>} : memref<1x8x128xf32, #tpu.memory_space<vmem>>, vector<1x8x128xf32>,
    return
  }
  func.func @transform_0(%arg0: i32, %arg1: i32) -> (i32, i32, i32) {
    %c1_i32 = arith.constant 1 : i32
    %0 = arith.muli %arg1, %c1_i32 : i32
    %c1_i32_0 = arith.constant 1 : i32
    %1 = arith.subi %0, %c1_i32_0 : i32
    %c0_i32 = arith.constant 0 : i32
    %2 = arith.maxsi %1, %c0_i32 : i32
    %c0_i32_1 = arith.constant 0 : i32
    %c0_i32_2 = arith.constant 0 : i32
    return %arg0, %2, %c0_i32_1 : i32, i32, i32
  }
  func.func @transform_1(%arg0: i32, %arg1: i32) -> (i32, i32, i32) {
    %c0_i32 = arith.constant 0 : i32
    %c0_i32_0 = arith.constant 0 : i32
    return %arg0, %arg1, %c0_i32 : i32, i32, i32
  }
  func.func @transform_2(%arg0: i32, %arg1: i32) -> (i32, i32, i32) {
    %c1_i32 = arith.constant 1 : i32
    %0 = arith.addi %arg1, %c1_i32 : i32
    %c1_i32_0 = arith.constant 1 : i32
    %1 = arith.muli %0, %c1_i32_0 : i32
    %c0_i32 = arith.constant 0 : i32
    %2 = arith.minsi %1, %c0_i32 : i32
    %c0_i32_1 = arith.constant 0 : i32
    %c0_i32_2 = arith.constant 0 : i32
    return %arg0, %2, %c0_i32_1 : i32, i32, i32
  }
  func.func @transform_3(%arg0: i32, %arg1: i32) -> (i32, i32) {
    %c0_i32 = arith.constant 0 : i32
    %c0_i32_0 = arith.constant 0 : i32
    %c0_i32_1 = arith.constant 0 : i32
    return %c0_i32, %c0_i32_0 : i32, i32
  }
  func.func @transform_4(%arg0: i32, %arg1: i32) -> (i32, i32) {
    %c0_i32 = arith.constant 0 : i32
    %c0_i32_0 = arith.constant 0 : i32
    %c0_i32_1 = arith.constant 0 : i32
    return %c0_i32, %c0_i32_0 : i32, i32
  }
  func.func @transform_5(%arg0: i32, %arg1: i32) -> (i32, i32, i32) {
    %c0_i32 = arith.constant 0 : i32
    %c0_i32_0 = arith.constant 0 : i32
    return %arg0, %arg1, %c0_i32 : i32, i32, i32
  }
}

</mosaic_0001>

<bundles_post_ra>
// kernel: tpu_custom_call.1
= control target key start
LH: loop header
LB: loop body
LE: loop exit
PB: predicated region body
PF: predicated region fallthrough
CT: control target
= control target key end

     0   :  { %10 = vsyncpa [#allocation3], 0  ;;  %s840_s0 = inlined_call_operand.vmem [shape: f32[2,8,4], index: 0, kind: input, shape index: {}]   ;;  %s841_s1 = inlined_call_operand.vmem [shape: f32[2,8,4], index: 1, kind: input, shape index: {}]   ;;  %s842_s2 = inlined_call_operand.vmem [shape: f32[2,8,4], index: 2, kind: input, shape index: {}]   ;;  %s843_s3 = inlined_call_operand.vmem [shape: bf16[12,128], index: 3, kind: input, shape index: {}]   ;;  %s844_s4 = inlined_call_operand.vmem [shape: f32[1,128], index: 4, kind: input, shape index: {}]   ;;  %s845_s5 = inlined_call_operand.hbm [shape: f32[2,8,128], index: 5, kind: output, shape index: {}]  }
   0x1   :  { %12 = vsyncpa [#allocation3 + $0x1], 0  ;;  %s734_s18 = smov 0   ;;  %s736_s0 = smov 0  }
   0x2   :  { %s738_s19 = smov 0   ;;  %s740_s20 = smov 0  }
   0x3   :  { %s742_s2 = smov 0   ;;  %s744_s21 = smov 0  }
   0x4 LB: > { %s541_s22 = sadd.s32 4294967295, %s699_s21   ;;  %s542_s23 = sadd.s32 4294967294, %s699_s21   ;;  %s699_s21 = sphi %s744_s21, %s18_s21   ;;  %s695_s2 = sphi %s742_s2, %s852_s2   ;;  %s691_s20 = sphi %s740_s20, %s851_s20   ;;  %s687_s19 = sphi %s738_s19, %s850_s19   ;;  %s683_s0 = sphi %s736_s0, %s849_s0   ;;  %s679_s18 = sphi %s734_s18, %s848_s18  }
   0x5   : > { %s30_s24 = sadd.s32 1, %s695_s2  ;;  %s177_s25 = sadd.s32 1, %s687_s19 }
   0x6   : > { %p32_p0 = scmp.ge.s32.totalorder %s30_s24, 2  ;;  %p187_p1 = scmp.ne.s32.totalorder %s687_s19, %s683_s0 }
   0x7   : > { %p188_p2 = scmp.eq.s32.totalorder %s541_s22, 1  ;;  %p193_p3 = scmp.ne.s32.totalorder %s683_s0, %s679_s18 }
   0x8   : > { %s854_s24 = smov (%p32_p0, %s30_s24), 0  ;;  %p194_p5 = scmp.eq.s32.totalorder %s542_s23, 1 }
   0x9   : > { %p774_p4 = por %p188_p2, %p187_p1  ;;  %s172_s27 = ssub.s32 %s695_s2, %s854_s24 }
   0xa   : > { %p545_p6 = scmp.ge.s32.totalorder %s699_s21, 1  ;;  %p175_p7 = scmp.eq.s32.totalorder %s172_s27, 0 }
   0xb   : > { %p781_p8 = por %p194_p5, %p193_p3  ;;  %p260_p9 = scmp.lt.s32.totalorder %s699_s21, 3 }
   0xc   : > { %s787_s29 = scalar_select %p175_p7, %s687_s19, %s177_s25  }
   0xd   : > { %p261_p10 = pnand %p545_p6, %p260_p9 }
   0xe   : > { %p323_p11 = scmp.lt.s32.totalorder (!%p261_p10), %s691_s20, 1  ;;  %s702_s10 = smov (!%p261_p10), 4  }
   0xf   : > { %264 = sbr.rel (%p261_p10) target bundleno = 295 (0x127), region = 40  ;;  %s703_s11 = smov (!%p261_p10), 8  }
  0x10   : > { %s307_s16 = sand.u32 (!%p261_p10), 1, %s683_s0   ;;  %s556_s25 = sshll.u32 (!%p261_p10), %s691_s20, 3 }
  0x11   : > { %s546_s23 = sshll.u32 (!%p261_p10), %s307_s16, 3  ;;  %s641_s14 = scalar_lea.hbm (!%p261_p10), %s845_s5, 16 }
  0x12   : > { %s309_s7 = scalar_lea.vmem (!%p261_p10), [#allocation2], %s546_s23 }
  0x13   : > { %s437_s8 = sshll.u32 (!%p261_p10), %s309_s7, 4  ;;  %s438_s8 = int_to_ptr.vmem [resolvable:$true] %s437_s8 }
  0x14   : > { %s324_s30 = scalar_select %p323_p11, %s691_s20, 1  ;;  %v701_v0 = vmov 0.0   ;;  %vm366_vm0 = vcmask 1040384   ;;  %vm371_vm1 = vcmask 1046528   ;;  %vm378_vm2 = vcmask 1045504  }
  0x15   : > { %v358_v1 = vrot.slane %v701_v0, 7  ;;  %v552_v12 = vld [vmem:[%s843_s3] sm:$0xf]  ;;  %v559_v13 = vld [vmem:[%s843_s3] sm:$0x30]  ;;  %vm385_vm3 = vcmask 31744  }
  0x16   : > { %s548_s6 = sshll.u32 %s324_s30, 3  ;;  %v553_v14 = vor.u32 %v559_v13, %v552_v12  ;;  %vm387_vm4 = vcmask 64512   ;;  %vm401_vm5 = vcmask 97280   ;;  %v618_v21 = vld [vmem:[%s844_s4] ss:$0 sm:$0xff] }
  0x17   : > { %s329_s9 = scalar_lea.vmem %s841_s1, %s548_s6  ;;  %s435_s6 = scalar_lea.hbm %s845_s5, %s556_s25 }
  0x18   : > { %v344_v2 = vld [vmem:[%s329_s9] sm:$0xff]  ;;  %v406_v15 = vsel %vm378_vm2, %v553_v14, 0  ;;  %s439_s9 = sshll.u32 %s435_s6, 4  ;;  %s440_s9 = int_to_ptr.hbm [resolvable:$true] %s439_s9 }
  0x19   : > { %v361_v3 = vrot.slane %v344_v2, 7  ;;  %415 = vmatpush.bf16.msra.mxu0 %v406_v15 }
  0x1b   : > { %v367_v4 = vsel %vm366_vm0, %v358_v1, %v361_v3  ;;  %v368_v5 = vsel %vm366_vm0, %v361_v3, %v358_v1 }
  0x1c   : > { %v372_v6 = vrot.slane %v367_v4, 1  ;;  %v373_v7 = vrot.slane %v368_v5, 1  ;;  %v379_v9 = vrot.slane %v367_v4, 2  ;;  %v380_v10 = vrot.slane %v368_v5, 2 }
  0x1e   : > { %v374_v8 = vsel %vm371_vm1, %v372_v6, %v373_v7  ;;  %v381_v11 = vsel %vm378_vm2, %v379_v9, %v380_v10 }
  0x1f   : > { %375 = vrot.lane.b32.xlu0 %v374_v8, %s702_s10  ;;  %s424_s10 = scalar_lea.sflag [#allocation3], %s307_s16 }
  0x27   : > { %382 = vrot.lane.b32.xlu0 %v381_v11, %s703_s11  ;;  %s635_s11 = sshra.s32 %s440_s9, 4  ;;  %s636_s11 = int_to_ptr.hbm [resolvable:$true] %s635_s11 }
  0x28   : > { %s637_s20 = scalar_lea.hbm %s636_s11, 8  ;;  %p642_p1 = scmp.lt.s32.totalorder %s636_s11, %s845_s5 }
  0x29   : > { %p638_p12 = scmp.ne.s32.totalorder %s636_s11, %s637_s20  ;;  %p643_p2 = scmp.lt.s32.totalorder %s641_s14, %s637_s20 }
  0x2b   : > { %p639_p13 = pnand %p638_p12, %p774_p4  ;;  %p644_p3 = por %p643_p2, %p642_p1 }
  0x2d   : > { %p640_p0 = pneg %p639_p13 }
  0x2f   : > { %p645_p5 = pnand %p644_p3, %p640_p0 }
  0x91   : > { %v376_v16 = vpop.permute.xlu0 %375 }
  0x92   : > { %v386_v17 = vsel %vm385_vm3, %v367_v4, %v376_v16 }
  0x99   : > { %v383_v18 = vpop.permute.xlu0 %382 }
  0x9a   : > { %v388_v19 = vsel %vm387_vm4, %v386_v17, %v383_v18 }
  0x9b   : > { %v389_v20 = vpack.c.bf16 %v388_v19, %v388_v19 }
  0x9d   : > { %554 = vmatmul.msk.bf16.vlgmr.msra.gmra.mxu0 %vm401_vm5, %v389_v20 }
 0x11a   : > { %v417_v22 = vpop.f32.mrf.mxu0 }
 0x11b   : > { %v418_v23 = vadd.f32 %v618_v21, %v417_v22 }
 0x11d   : > { %619 = vtanh.f32 %v418_v23 }
 0x122   : > { %v419_v24 = vpop.f32.mrf.mxu0 }
 0x123   : > { %v620_v25 = vpop.eup %619 }
 0x124   : > { %422 = vst [vmem:[%s309_s7] sm:$0xff] %v620_v25 }
 0x125   : > { %648 = shalt.err (!%p645_p5)
}
 0x126   : > { %560 = dma.vmem_to_hbm [thread:$0]  (%p774_p4), %s438_s8, 128, %s440_s9, %s424_s10  }
 0x127 PF: > { %p566_p6 = scmp.ge.s32.totalorder %s699_s21, 2  ;;  %s451_s16 = sand.u32 1, %s679_s18  }
 0x128   : > { %s452_s22 = scalar_lea.sflag [#allocation3], %s451_s16 }
 0x129   : > { %p563_p7 = pnand %p566_p6, %p781_p8 }
 0x12b   : > { %p564_p9 = pneg %p563_p7 }
 0x12d   : > { %674 = dma.done.wait (%p564_p9), %s452_s22, 128  }
 0x12e   : > { %676 = vsyncadd (%p564_p9), %s452_s22, 4294967168  ;;  %s18_s21 = sadd.s32 1, %s699_s21   ;;  %s848_s18 = smov %s683_s0 }
 0x12f   : > { %p15_p10 = scmp.ge.s32.totalorder %s18_s21, 4   ;;  %s849_s0 = smov %s687_s19 }
 0x130   : > { %s850_s19 = smov %s787_s29  ;;  %s851_s20 = smov %s695_s2 }
 0x131   : > { %s852_s2 = smov %s854_s24  ;;  %17 = sbr.rel (!%p15_p10) target bundleno = 4 (0x4), region = 81 }
 0x136   :  { %458 = vsyncpa [#allocation3], 1 }
 0x137   :  { %460 = vsyncpa [#allocation3 + $0x1], 1 }

// kernel: tpu_custom_call.1
= control target key start
LH: loop header
LB: loop body
LE: loop exit
PB: predicated region body
PF: predicated region fallthrough
CT: control target
= control target key end

     0   :  { %10 = vsyncpa [#allocation3], 0  ;;  %s840_s0 = inlined_call_operand.vmem [shape: f32[2,8,4], index: 0, kind: input, shape index: {}]   ;;  %s841_s1 = inlined_call_operand.vmem [shape: f32[2,8,4], index: 1, kind: input, shape index: {}]   ;;  %s842_s2 = inlined_call_operand.vmem [shape: f32[2,8,4], index: 2, kind: input, shape index: {}]   ;;  %s843_s3 = inlined_call_operand.vmem [shape: bf16[12,128], index: 3, kind: input, shape index: {}]   ;;  %s844_s4 = inlined_call_operand.vmem [shape: f32[1,128], index: 4, kind: input, shape index: {}]   ;;  %s845_s5 = inlined_call_operand.hbm [shape: f32[2,8,128], index: 5, kind: output, shape index: {}]  }
   0x1   :  { %12 = vsyncpa [#allocation3 + $0x1], 0  ;;  %s734_s18 = smov 0   ;;  %s736_s0 = smov 0  }
   0x2   :  { %s738_s19 = smov 0   ;;  %s740_s20 = smov 0  }
   0x3   :  { %s742_s2 = smov 0   ;;  %s744_s21 = smov 0  }
   0x4 LB: > { %s541_s22 = sadd.s32 4294967295, %s699_s21   ;;  %s542_s23 = sadd.s32 4294967294, %s699_s21   ;;  %s699_s21 = sphi %s744_s21, %s18_s21   ;;  %s695_s2 = sphi %s742_s2, %s852_s2   ;;  %s691_s20 = sphi %s740_s20, %s851_s20   ;;  %s687_s19 = sphi %s738_s19, %s850_s19   ;;  %s683_s0 = sphi %s736_s0, %s849_s0   ;;  %s679_s18 = sphi %s734_s18, %s848_s18  }
   0x5   : > { %s30_s24 = sadd.s32 1, %s695_s2  ;;  %s177_s25 = sadd.s32 1, %s687_s19 }
   0x6   : > { %p32_p0 = scmp.ge.s32.totalorder %s30_s24, 2  ;;  %p187_p1 = scmp.ne.s32.totalorder %s687_s19, %s683_s0 }
   0x7   : > { %p188_p2 = scmp.eq.s32.totalorder %s541_s22, 1  ;;  %p193_p3 = scmp.ne.s32.totalorder %s683_s0, %s679_s18 }
   0x8   : > { %s854_s24 = smov (%p32_p0, %s30_s24), 0  ;;  %p194_p5 = scmp.eq.s32.totalorder %s542_s23, 1 }
   0x9   : > { %p774_p4 = por %p188_p2, %p187_p1  ;;  %s172_s27 = ssub.s32 %s695_s2, %s854_s24 }
   0xa   : > { %p545_p6 = scmp.ge.s32.totalorder %s699_s21, 1  ;;  %p175_p7 = scmp.eq.s32.totalorder %s172_s27, 0 }
   0xb   : > { %p781_p8 = por %p194_p5, %p193_p3  ;;  %p260_p9 = scmp.lt.s32.totalorder %s699_s21, 3 }
   0xc   : > { %s787_s29 = scalar_select %p175_p7, %s687_s19, %s177_s25  }
   0xd   : > { %p261_p10 = pnand %p545_p6, %p260_p9 }
   0xe   : > { %p323_p11 = scmp.lt.s32.totalorder (!%p261_p10), %s691_s20, 1  ;;  %s702_s10 = smov (!%p261_p10), 4  }
   0xf   : > { %264 = sbr.rel (%p261_p10) target bundleno = 295 (0x127), region = 40  ;;  %s703_s11 = smov (!%p261_p10), 8  }
  0x10   : > { %s307_s16 = sand.u32 (!%p261_p10), 1, %s683_s0   ;;  %s556_s25 = sshll.u32 (!%p261_p10), %s691_s20, 3 }
  0x11   : > { %s546_s23 = sshll.u32 (!%p261_p10), %s307_s16, 3  ;;  %s641_s14 = scalar_lea.hbm (!%p261_p10), %s845_s5, 16 }
  0x12   : > { %s309_s7 = scalar_lea.vmem (!%p261_p10), [#allocation2], %s546_s23 }
  0x13   : > { %s437_s8 = sshll.u32 (!%p261_p10), %s309_s7, 4  ;;  %s438_s8 = int_to_ptr.vmem [resolvable:$true] %s437_s8 }
  0x14   : > { %s324_s30 = scalar_select %p323_p11, %s691_s20, 1  ;;  %v701_v0 = vmov 0.0   ;;  %vm366_vm0 = vcmask 1040384   ;;  %vm371_vm1 = vcmask 1046528   ;;  %vm378_vm2 = vcmask 1045504  }
  0x15   : > { %v358_v1 = vrot.slane %v701_v0, 7  ;;  %v552_v12 = vld [vmem:[%s843_s3] sm:$0xf]  ;;  %v559_v13 = vld [vmem:[%s843_s3] sm:$0x30]  ;;  %vm385_vm3 = vcmask 31744  }
  0x16   : > { %s548_s6 = sshll.u32 %s324_s30, 3  ;;  %v553_v14 = vor.u32 %v559_v13, %v552_v12  ;;  %vm387_vm4 = vcmask 64512   ;;  %vm401_vm5 = vcmask 97280   ;;  %v618_v21 = vld [vmem:[%s844_s4] ss:$0 sm:$0xff] }
  0x17   : > { %s329_s9 = scalar_lea.vmem %s841_s1, %s548_s6  ;;  %s435_s6 = scalar_lea.hbm %s845_s5, %s556_s25 }
  0x18   : > { %v344_v2 = vld [vmem:[%s329_s9] sm:$0xff]  ;;  %v406_v15 = vsel %vm378_vm2, %v553_v14, 0  ;;  %s439_s9 = sshll.u32 %s435_s6, 4  ;;  %s440_s9 = int_to_ptr.hbm [resolvable:$true] %s439_s9 }
  0x19   : > { %v361_v3 = vrot.slane %v344_v2, 7  ;;  %415 = vmatpush.bf16.msra.mxu0 %v406_v15 }
  0x1b   : > { %v367_v4 = vsel %vm366_vm0, %v358_v1, %v361_v3  ;;  %v368_v5 = vsel %vm366_vm0, %v361_v3, %v358_v1 }
  0x1c   : > { %v372_v6 = vrot.slane %v367_v4, 1  ;;  %v373_v7 = vrot.slane %v368_v5, 1  ;;  %v379_v9 = vrot.slane %v367_v4, 2  ;;  %v380_v10 = vrot.slane %v368_v5, 2 }
  0x1e   : > { %v374_v8 = vsel %vm371_vm1, %v372_v6, %v373_v7  ;;  %v381_v11 = vsel %vm378_vm2, %v379_v9, %v380_v10 }
  0x1f   : > { %375 = vrot.lane.b32.xlu0 %v374_v8, %s702_s10  ;;  %s424_s10 = scalar_lea.sflag [#allocation3], %s307_s16 }
  0x27   : > { %382 = vrot.lane.b32.xlu0 %v381_v11, %s703_s11  ;;  %s635_s11 = sshra.s32 %s440_s9, 4  ;;  %s636_s11 = int_to_ptr.hbm [resolvable:$true] %s635_s11 }
  0x28   : > { %s637_s20 = scalar_lea.hbm %s636_s11, 8  ;;  %p642_p1 = scmp.lt.s32.totalorder %s636_s11, %s845_s5 }
  0x29   : > { %p638_p12 = scmp.ne.s32.totalorder %s636_s11, %s637_s20  ;;  %p643_p2 = scmp.lt.s32.totalorder %s641_s14, %s637_s20 }
  0x2b   : > { %p639_p13 = pnand %p638_p12, %p774_p4  ;;  %p644_p3 = por %p643_p2, %p642_p1 }
  0x2d   : > { %p640_p0 = pneg %p639_p13 }
  0x2f   : > { %p645_p5 = pnand %p644_p3, %p640_p0 }
  0x91   : > { %v376_v16 = vpop.permute.xlu0 %375 }
  0x92   : > { %v386_v17 = vsel %vm385_vm3, %v367_v4, %v376_v16 }
  0x99   : > { %v383_v18 = vpop.permute.xlu0 %382 }
  0x9a   : > { %v388_v19 = vsel %vm387_vm4, %v386_v17, %v383_v18 }
  0x9b   : > { %v389_v20 = vpack.c.bf16 %v388_v19, %v388_v19 }
  0x9d   : > { %554 = vmatmul.msk.bf16.vlgmr.msra.gmra.mxu0 %vm401_vm5, %v389_v20 }
 0x11a   : > { %v417_v22 = vpop.f32.mrf.mxu0 }
 0x11b   : > { %v418_v23 = vadd.f32 %v618_v21, %v417_v22 }
 0x11d   : > { %619 = vtanh.f32 %v418_v23 }
 0x122   : > { %v419_v24 = vpop.f32.mrf.mxu0 }
 0x123   : > { %v620_v25 = vpop.eup %619 }
 0x124   : > { %422 = vst [vmem:[%s309_s7] sm:$0xff] %v620_v25 }
 0x125   : > { %648 = shalt.err (!%p645_p5)
}
 0x126   : > { %560 = dma.vmem_to_hbm [thread:$0]  (%p774_p4), %s438_s8, 128, %s440_s9, %s424_s10  }
 0x127 PF: > { %p566_p6 = scmp.ge.s32.totalorder %s699_s21, 2  ;;  %s451_s16 = sand.u32 1, %s679_s18  }
 0x128   : > { %s452_s22 = scalar_lea.sflag [#allocation3], %s451_s16 }
 0x129   : > { %p563_p7 = pnand %p566_p6, %p781_p8 }
 0x12b   : > { %p564_p9 = pneg %p563_p7 }
 0x12d   : > { %674 = dma.done.wait (%p564_p9), %s452_s22, 128  }
 0x12e   : > { %676 = vsyncadd (%p564_p9), %s452_s22, 4294967168  ;;  %s18_s21 = sadd.s32 1, %s699_s21   ;;  %s848_s18 = smov %s683_s0 }
 0x12f   : > { %p15_p10 = scmp.ge.s32.totalorder %s18_s21, 4   ;;  %s849_s0 = smov %s687_s19 }
 0x130   : > { %s850_s19 = smov %s787_s29  ;;  %s851_s20 = smov %s695_s2 }
 0x131   : > { %s852_s2 = smov %s854_s24  ;;  %17 = sbr.rel (!%p15_p10) target bundleno = 4 (0x4), region = 81 }
 0x136   :  { %458 = vsyncpa [#allocation3], 1 }
 0x137   :  { %460 = vsyncpa [#allocation3 + $0x1], 1 }

</bundles_post_ra>
